<compile_context>
chip_gen: v7x
topology: tpu7x:2x2x1
jax: 0.10.0
libtpu: 0.0.40
codegen_flags: <defaults>
</compile_context>

<pallas_src>
import functools

import jax
import jax.numpy as jnp
from jax.experimental import pallas as pl
from jax.experimental.pallas import tpu as pltpu


def _sdpa_kernel(*refs, scale, has_mask, use_key_len, return_attn):
    it = iter(refs)
    keylen_ref = next(it)                 # (B,) int32, SMEM (scalar prefetch)
    q_ref = next(it)                      # (1, 1, tq, Dk)
    k_ref = next(it)                      # (1, 1, Lk_pad, Dk)
    v_ref = next(it)                      # (1, 1, Lk_pad, Dv_pad)
    mask_ref = next(it) if has_mask else None
    out_ref = next(it)                    # (1, 1, tq, Dv_pad)
    attn_ref = next(it) if return_attn else None

    # Fold 1/temperature into q: tq*Dk multiplies instead of tq*Lk.
    q = q_ref[0, 0] * scale
    k = k_ref[0, 0]
    v = v_ref[0, 0]

    # scores = (q / temperature) @ k^T, f32 accumulation on the MXU.
    s = jax.lax.dot_general(q, k, (((1,), (1,)), ((), ())),
                            preferred_element_type=jnp.float32)

    # Masking: build validity once, single select pass over the score tile.
    valid = None
    if use_key_len:
        klen = keylen_ref[pl.program_id(0)]
        key_pos = jax.lax.broadcasted_iota(jnp.int32, s.shape, 1)
        valid = key_pos < klen
    if has_mask:
        mvalid = mask_ref[0, 0] != 0
        valid = mvalid if valid is None else jnp.logical_and(valid, mvalid)
    if valid is not None:
        s = jnp.where(valid, s, -1e9)     # matches masked_fill(mask==0, -1e9)

    # Numerically stable softmax over keys in f32; reciprocal on the EUP.
    m = jnp.max(s, axis=-1, keepdims=True)
    e = jnp.exp(s - m)
    denom = jnp.sum(e, axis=-1, keepdims=True)
    p = e * pl.reciprocal(denom, approx=True)

    # TODO(synk): nn.Dropout(attn_dropout) is identity here (inference mode).
    if return_attn:
        attn_ref[0, 0] = p.astype(attn_ref.dtype)

    out = jnp.dot(p.astype(v.dtype), v, preferred_element_type=jnp.float32)
    out_ref[0, 0] = out.astype(out_ref.dtype)


def _round_up(x, m):
    return ((x + m - 1) // m) * m


def _vmem_limit_bytes():
    phys = None
    try:
        info = pltpu.get_tpu_info()
        phys = getattr(info, "vmem_capacity_bytes", None)
    except Exception:
        phys = None
    if not phys:
        phys = 64 * 1024 * 1024            # conservative default: v7x per-core
    return int(phys) * 3 // 4              # headroom for compiler scratch


def _pick_tq(lq, lk, dk, dv, in_itemsize, attn_itemsize, has_mask,
             return_attn, sub, block_budget):
    """Largest query tile whose resident blocks fit the VMEM budget."""
    fixed = 2 * lk * (dk + dv) * in_itemsize          # K + V (double-buffered)
    per_row = (2 * dk * in_itemsize                   # q tile
               + 2 * dv * in_itemsize                 # out tile
               + (2 * lk * attn_itemsize if return_attn else 0)   # attn tile
               + (2 * lk if has_mask else 0)          # int8 mask tile
               + 3 * lk * 4)                          # live f32 scores/exp/select
    avail = block_budget - fixed
    tq = max(sub, avail // per_row) if avail > 0 else sub
    tq = min(int(tq), 1024)
    if tq >= 256:
        tq = (tq // 256) * 256                        # clean MXU M granularity
    else:
        tq = max(sub, (tq // sub) * sub)
    tq = min(tq, _round_up(lq, sub))                  # don't exceed query rows
    return int(tq)


def scaled_dot_product_attention(q, k, v, mask=None, *, temperature,
                                 key_valid_len=None, return_attn=True,
                                 attn_dtype=None, tq=None):
    """q: (B, H, Lq, Dk), k: (B, H, Lk, Dk), v: (B, H, Lk, Dv).

    mask: optional dense mask broadcastable to (B, 1|H, Lq, Lk); 0 => masked.
    key_valid_len: optional (B,) int32 valid key lengths (preferred over a
        dense length mask: mask is rebuilt in-kernel, no HBM mask traffic).
    return_attn: if False, the (B,H,Lq,Lk) attention writeback is skipped.
    Returns (output (B,H,Lq,Dv), attn (B,H,Lq,Lk) or None)."""
    B, H, Lq, Dk = q.shape
    Lk = k.shape[2]
    Dv = v.shape[3]
    scale = 1.0 / float(temperature)
    in_itemsize = q.dtype.itemsize
    attn_dtype = jnp.dtype(attn_dtype) if attn_dtype is not None else q.dtype

    # Lane-dense padding (last dims -> multiples of 128) for K/V/attn/out.
    lk_pad = _round_up(Lk, 128)
    dv_pad = _round_up(Dv, 128)
    if lk_pad != Lk:
        k = jnp.pad(k, ((0, 0), (0, 0), (0, lk_pad - Lk), (0, 0)))
        v = jnp.pad(v, ((0, 0), (0, 0), (0, lk_pad - Lk), (0, 0)))
    if dv_pad != Dv:
        v = jnp.pad(v, ((0, 0), (0, 0), (0, 0), (0, dv_pad - Dv)))

    has_mask = mask is not None
    use_key_len = (key_valid_len is not None) or (lk_pad != Lk)

    # Query tile from a per-generation VMEM budget; sublane-multiple rounding.
    vmem_limit = _vmem_limit_bytes()
    sub = 32 if has_mask else max(8, 32 // in_itemsize)
    if tq is None:
        tq = _pick_tq(Lq, lk_pad, Dk, dv_pad, in_itemsize, attn_dtype.itemsize,
                      has_mask, return_attn, sub,
                      block_budget=vmem_limit * 85 // 100)
    tq = max(sub, _round_up(min(int(tq), _round_up(Lq, sub)), sub))
    n_qt = pl.cdiv(Lq, tq)
    lq_pad = n_qt * tq
    if lq_pad != Lq:
        q = jnp.pad(q, ((0, 0), (0, 0), (0, lq_pad - Lq), (0, 0)))

    # Scalar-prefetched per-batch key lengths (also masks the Lk padding).
    if key_valid_len is None:
        key_len = jnp.full((B,), Lk, dtype=jnp.int32)
    else:
        key_len = jnp.asarray(key_valid_len, dtype=jnp.int32).reshape(B)

    inputs = [key_len, q, k, v]
    in_specs = [
        pl.BlockSpec((1, 1, tq, Dk), lambda b, h, qi, *_: (b, h, qi, 0)),
        pl.BlockSpec((1, 1, lk_pad, Dk), lambda b, h, qi, *_: (b, h, 0, 0)),
        pl.BlockSpec((1, 1, lk_pad, dv_pad), lambda b, h, qi, *_: (b, h, 0, 0)),
    ]
    if has_mask:
        mask = jnp.broadcast_to(mask, (B, mask.shape[1], Lq, Lk)).astype(jnp.int8)
        if lq_pad != Lq or lk_pad != Lk:
            mask = jnp.pad(mask, ((0, 0), (0, 0), (0, lq_pad - Lq),
                                  (0, lk_pad - Lk)), constant_values=1)
        if mask.shape[1] == 1:                        # broadcast over heads
            mask_map = lambda b, h, qi, *_: (b, 0, qi, 0)
        else:
            mask_map = lambda b, h, qi, *_: (b, h, qi, 0)
        in_specs.append(pl.BlockSpec((1, 1, tq, lk_pad), mask_map))
        inputs.append(mask)

    out_shapes = [jax.ShapeDtypeStruct((B, H, lq_pad, dv_pad), q.dtype)]
    out_specs = [pl.BlockSpec((1, 1, tq, dv_pad),
                              lambda b, h, qi, *_: (b, h, qi, 0))]
    if return_attn:
        out_shapes.append(jax.ShapeDtypeStruct((B, H, lq_pad, lk_pad), attn_dtype))
        out_specs.append(pl.BlockSpec((1, 1, tq, lk_pad),
                                      lambda b, h, qi, *_: (b, h, qi, 0)))

    # Advisory cost estimate (K/V fetched once per (b,h); mask re-fetched/head).
    flops = 2 * B * H * lq_pad * lk_pad * (Dk + dv_pad)
    transcendentals = B * H * lq_pad * lk_pad
    bytes_accessed = (
        B * H * (lq_pad * Dk + lk_pad * Dk + lk_pad * dv_pad) * in_itemsize
        + B * H * lq_pad * dv_pad * in_itemsize
        + (B * H * lq_pad * lk_pad * attn_dtype.itemsize if return_attn else 0)
        + (B * H * lq_pad * lk_pad if has_mask else 0))
    cost = pl.CostEstimate(flops=int(flops), transcendentals=int(transcendentals),
                           bytes_accessed=int(bytes_accessed))

    results = pl.pallas_call(
        functools.partial(_sdpa_kernel, scale=scale, has_mask=has_mask,
                          use_key_len=use_key_len, return_attn=return_attn),
        out_shape=tuple(out_shapes),
        grid_spec=pltpu.PrefetchScalarGridSpec(
            num_scalar_prefetch=1,
            grid=(B, H, n_qt),
            in_specs=in_specs,
            out_specs=tuple(out_specs),
        ),
        compiler_params=pltpu.CompilerParams(
            dimension_semantics=("parallel", "parallel", "parallel"),
            vmem_limit_bytes=int(vmem_limit),
        ),
        cost_estimate=cost,
    )(*inputs)

    out = results[0][:, :, :Lq, :Dv]
    attn = results[1][:, :, :Lq, :Lk] if return_attn else None
    return out, attn


def _reference(q, k, v, mask, temperature):
    attn = jnp.matmul(q / temperature, jnp.swapaxes(k, -2, -1))
    if mask is not None:
        attn = jnp.where(mask == 0, -1e9, attn)
    attn = jax.nn.softmax(attn, axis=-1)
    out = jnp.matmul(attn, v)
    return out, attn


if __name__ == "__main__":
    batch, n_head, len_q, len_k, d_k, d_v = 2, 4, 8, 16, 32, 32
    temperature = d_k ** 0.5

    key = jax.random.PRNGKey(0)
    kq, kk, kv = jax.random.split(key, 3)
    q = jax.random.normal(kq, (batch, n_head, len_q, d_k), dtype=jnp.float32)
    k = jax.random.normal(kk, (batch, n_head, len_k, d_k), dtype=jnp.float32)
    v = jax.random.normal(kv, (batch, n_head, len_k, d_v), dtype=jnp.float32)

    # Per-batch key-length mask (0 => masked), broadcast over heads.
    valid_len = jnp.array([12, 16], dtype=jnp.int32)
    mask = (jnp.arange(len_k)[None, None, None, :]
            < valid_len[:, None, None, None]).astype(jnp.int32)
    mask = jnp.broadcast_to(mask, (batch, 1, len_q, len_k))

    ref_out, ref_attn = _reference(q, k, v, mask, temperature)
    ref_out_nomask, _ = _reference(q, k, v, None, temperature)

    # Path 1: scalar-prefetched key lengths (preferred; no HBM mask traffic).
    out1, attn1 = scaled_dot_product_attention(
        q, k, v, key_valid_len=valid_len, temperature=temperature)
    out1 = jax.block_until_ready(out1)
    attn1 = jax.block_until_ready(attn1)

    # Path 2: arbitrary dense mask (shipped as int8).
    out2, attn2 = scaled_dot_product_attention(
        q, k, v, mask, temperature=temperature)
    out2 = jax.block_until_ready(out2)
    attn2 = jax.block_until_ready(attn2)

    # Path 3: no mask and no attention writeback (output only).
    out3, attn3 = scaled_dot_product_attention(
        q, k, v, temperature=temperature, return_attn=False)
    out3 = jax.block_until_ready(out3)

    assert out1.shape == (batch, n_head, len_q, d_v) and out1.dtype == q.dtype
    assert attn1.shape == (batch, n_head, len_q, len_k) and attn1.dtype == q.dtype
    for o, a in ((out1, attn1), (out2, attn2)):
        assert jnp.allclose(o, ref_out, atol=2e-3, rtol=2e-3), "output mismatch vs reference"
        assert jnp.allclose(a, ref_attn, atol=2e-3, rtol=2e-3), "attn mismatch vs reference"
    assert attn3 is None
    assert jnp.allclose(out3, ref_out_nomask, atol=2e-3, rtol=2e-3), "no-mask output mismatch"

    print("KERNEL_OK")
</pallas_src>

<mosaic_0001>
module attributes {stable_mosaic.version = 11 : i64} {
  func.func @_sdpa_kernel(%arg0: i32, %arg1: i32, %arg2: i32, %arg3: memref<2xi32, #tpu.memory_space<smem>>, %arg4: memref<1x1x8x32xf32, #tpu.memory_space<vmem>>, %arg5: memref<1x1x128x32xf32, #tpu.memory_space<vmem>>, %arg6: memref<1x1x128x128xf32, #tpu.memory_space<vmem>>, %arg7: memref<1x1x8x128xf32, #tpu.memory_space<vmem>>, %arg8: memref<1x1x8x128xf32, #tpu.memory_space<vmem>>) attributes {dimension_semantics = [#tpu.dimension_semantics<parallel>, #tpu.dimension_semantics<parallel>, #tpu.dimension_semantics<parallel>], iteration_bounds = array<i64: 2, 4, 1>, scalar_prefetch = 1 : i64, scratch_operands = 0 : i64, tpu.core_type = #tpu.core_type<tc>, window_params = [{transform_indices = @transform_0, window_bounds = array<i64: 1, 1, 8, 32>}, {transform_indices = @transform_1, window_bounds = array<i64: 1, 1, 128, 32>}, {transform_indices = @transform_2, window_bounds = array<i64: 1, 1, 128, 128>}, {transform_indices = @transform_3, window_bounds = array<i64: 1, 1, 8, 128>}, {transform_indices = @transform_4, window_bounds = array<i64: 1, 1, 8, 128>}]} {
    %c0 = arith.constant 0 : index
    %c0_0 = arith.constant 0 : index
    %c0_1 = arith.constant 0 : index
    %c0_2 = arith.constant 0 : index
    %0 = vector.load %arg4[%c0, %c0_0, %c0_1, %c0_2] : memref<1x1x8x32xf32, #tpu.memory_space<vmem>>, vector<1x1x8x32xf32>
    %1 = vector.shape_cast %0 : vector<1x1x8x32xf32> to vector<8x32xf32>
    %cst = arith.constant 0.176776692 : f32
    %2 = vector.broadcast %cst : f32 to vector<8x32xf32>
    %3 = arith.mulf %1, %2 : vector<8x32xf32>
    %c0_3 = arith.constant 0 : index
    %c0_4 = arith.constant 0 : index
    %c0_5 = arith.constant 0 : index
    %c0_6 = arith.constant 0 : index
    %4 = vector.load %arg5[%c0_3, %c0_4, %c0_5, %c0_6] : memref<1x1x128x32xf32, #tpu.memory_space<vmem>>, vector<1x1x128x32xf32>
    %5 = vector.shape_cast %4 : vector<1x1x128x32xf32> to vector<128x32xf32>
    %c0_7 = arith.constant 0 : index
    %c0_8 = arith.constant 0 : index
    %c0_9 = arith.constant 0 : index
    %c0_10 = arith.constant 0 : index
    %6 = vector.load %arg6[%c0_7, %c0_8, %c0_9, %c0_10] : memref<1x1x128x128xf32, #tpu.memory_space<vmem>>, vector<1x1x128x128xf32>
    %7 = vector.shape_cast %6 : vector<1x1x128x128xf32> to vector<128x128xf32>
    %cst_11 = arith.constant dense<0.000000e+00> : vector<8x128xf32>
    %8 = tpu.matmul %3, %5, %cst_11 {dimension_numbers = #tpu.dot_dimension_numbers<[1], [1], [0], [0], [0, 0, 1, 0], [], []>} : vector<8x32xf32>, vector<128x32xf32>, vector<8x128xf32> -> vector<8x128xf32>
    %9 = arith.index_cast %arg0 : i32 to index
    %10 = memref.load %arg3[%9] : memref<2xi32, #tpu.memory_space<smem>>
    %11 = tpu.iota {dimensions = array<i32: 1>} : vector<8x128xi32>
    %12 = vector.broadcast %10 : i32 to vector<8x128xi32>
    %13 = arith.cmpi slt, %11, %12 : vector<8x128xi32>
    %cst_12 = arith.constant -1.000000e+09 : f32
    %14 = vector.broadcast %cst_12 : f32 to vector<8x128xf32>
    %15 = arith.select %13, %8, %14 : vector<8x128xi1>, vector<8x128xf32>
    %cst_13 = arith.constant dense<0xFF800000> : vector<8xf32>
    %16 = vector.multi_reduction <maximumf>, %15, %cst_13 [1] : vector<8x128xf32> to vector<8xf32>
    %17 = vector.shape_cast %16 : vector<8xf32> to vector<8x1xf32>
    %18 = vector.broadcast %17 : vector<8x1xf32> to vector<8x128xf32>
    %19 = arith.subf %15, %18 : vector<8x128xf32>
    %20 = math.exp %19 : vector<8x128xf32>
    %cst_14 = arith.constant dense<0.000000e+00> : vector<8xf32>
    %21 = vector.multi_reduction <add>, %20, %cst_14 [1] : vector<8x128xf32> to vector<8xf32>
    %22 = vector.shape_cast %21 : vector<8xf32> to vector<8x1xf32>
    %23 = tpu.reciprocal %22 {approx = true} : vector<8x1xf32> -> vector<8x1xf32>
    %24 = vector.broadcast %23 : vector<8x1xf32> to vector<8x128xf32>
    %25 = arith.mulf %20, %24 : vector<8x128xf32>
    %c0_15 = arith.constant 0 : index
    %c0_16 = arith.constant 0 : index
    %c0_17 = arith.constant 0 : index
    %c0_18 = arith.constant 0 : index
    %26 = vector.load %arg8[%c0_15, %c0_16, %c0_17, %c0_18] : memref<1x1x8x128xf32, #tpu.memory_space<vmem>>, vector<1x1x8x128xf32>
    %27 = vector.shape_cast %26 : vector<1x1x8x128xf32> to vector<8x128xf32>
    %28 = vector.shape_cast %25 : vector<8x128xf32> to vector<1x1x8x128xf32>
    tpu.vector_store %arg8[%c0_15, %c0_16, %c0_17, %c0_18], %28 {strides = array<i32>} : memref<1x1x8x128xf32, #tpu.memory_space<vmem>>, vector<1x1x8x128xf32>,
    %cst_19 = arith.constant dense<0.000000e+00> : vector<8x128xf32>
    %29 = tpu.matmul %25, %7, %cst_19 {dimension_numbers = #tpu.dot_dimension_numbers<[1], [0], [0], [1], [0, 0, 1, 1], [], []>} : vector<8x128xf32>, vector<128x128xf32>, vector<8x128xf32> -> vector<8x128xf32>
    %c0_20 = arith.constant 0 : index
    %c0_21 = arith.constant 0 : index
    %c0_22 = arith.constant 0 : index
    %c0_23 = arith.constant 0 : index
    %30 = vector.load %arg7[%c0_20, %c0_21, %c0_22, %c0_23] : memref<1x1x8x128xf32, #tpu.memory_space<vmem>>, vector<1x1x8x128xf32>
    %31 = vector.shape_cast %30 : vector<1x1x8x128xf32> to vector<8x128xf32>
    %32 = vector.shape_cast %29 : vector<8x128xf32> to vector<1x1x8x128xf32>
    tpu.vector_store %arg7[%c0_20, %c0_21, %c0_22, %c0_23], %32 {strides = array<i32>} : memref<1x1x8x128xf32, #tpu.memory_space<vmem>>, vector<1x1x8x128xf32>,
    return
  }
  func.func @transform_0(%arg0: i32, %arg1: i32, %arg2: i32, %arg3: memref<2xi32, #tpu.memory_space<smem>>) -> (i32, i32, i32, i32) {
    %c0_i32 = arith.constant 0 : i32
    %c0_i32_0 = arith.constant 0 : i32
    return %arg0, %arg1, %arg2, %c0_i32 : i32, i32, i32, i32
  }
  func.func @transform_1(%arg0: i32, %arg1: i32, %arg2: i32, %arg3: memref<2xi32, #tpu.memory_space<smem>>) -> (i32, i32, i32, i32) {
    %c0_i32 = arith.constant 0 : i32
    %c0_i32_0 = arith.constant 0 : i32
    %c0_i32_1 = arith.constant 0 : i32
    return %arg0, %arg1, %c0_i32, %c0_i32_0 : i32, i32, i32, i32
  }
  func.func @transform_2(%arg0: i32, %arg1: i32, %arg2: i32, %arg3: memref<2xi32, #tpu.memory_space<smem>>) -> (i32, i32, i32, i32) {
    %c0_i32 = arith.constant 0 : i32
    %c0_i32_0 = arith.constant 0 : i32
    %c0_i32_1 = arith.constant 0 : i32
    return %arg0, %arg1, %c0_i32, %c0_i32_0 : i32, i32, i32, i32
  }
  func.func @transform_3(%arg0: i32, %arg1: i32, %arg2: i32, %arg3: memref<2xi32, #tpu.memory_space<smem>>) -> (i32, i32, i32, i32) {
    %c0_i32 = arith.constant 0 : i32
    %c0_i32_0 = arith.constant 0 : i32
    return %arg0, %arg1, %arg2, %c0_i32 : i32, i32, i32, i32
  }
  func.func @transform_4(%arg0: i32, %arg1: i32, %arg2: i32, %arg3: memref<2xi32, #tpu.memory_space<smem>>) -> (i32, i32, i32, i32) {
    %c0_i32 = arith.constant 0 : i32
    %c0_i32_0 = arith.constant 0 : i32
    return %arg0, %arg1, %arg2, %c0_i32 : i32, i32, i32, i32
  }
}

</mosaic_0001>

<bundles_post_ra>
// kernel: tpu_custom_call.1
= control target key start
LH: loop header
LB: loop body
LE: loop exit
PB: predicated region body
PF: predicated region fallthrough
CT: control target
= control target key end

     0   :  { %s1506_s0 = inlined_call_operand.vmem [shape: s32[2], index: 0, kind: input, shape index: {}]   ;;  %s1507_s1 = inlined_call_operand.vmem [shape: f32[2,4,8,32], index: 1, kind: input, shape index: {}]   ;;  %s1508_s2 = inlined_call_operand.vmem [shape: f32[2,4,128,32], index: 2, kind: input, shape index: {}]   ;;  %s1509_s3 = inlined_call_operand.vmem [shape: f32[2,4,128,128], index: 3, kind: input, shape index: {}]   ;;  %s1510_s4 = inlined_call_operand.hbm [shape: f32[2,4,8,128], index: 4, kind: output, shape index: {0}]   ;;  %s1511_s5 = inlined_call_operand.hbm [shape: f32[2,4,8,128], index: 5, kind: output, shape index: {1}]  }
   0x1   :  { %s11_s20 = sshll.u32 %s1506_s0, 4  ;;  %s12_s20 = int_to_ptr.vmem [resolvable:$true] %s11_s20 }
   0x2   :  { %s1058_s21 = scalar_lea.vmem %s12_s20, 16  ;;  %p1063_p1 = scmp.lt.s32.totalorder %s12_s20, %s12_s20 }
   0x3   :  { %p1059_p0 = scmp.ne.s32.totalorder %s12_s20, %s1058_s21  ;;  %p1064_p2 = scmp.lt.s32.totalorder %s1058_s21, %s1058_s21 }
   0x5   :  { %p1065_p3 = por %p1064_p2, %p1063_p1 }
   0x7   :  { %p1066_p4 = pnand %p1065_p3, %p1059_p0 }
   0x9   :  { %1069 = shalt.err (!%p1066_p4)  }
   0xa   :  { %s1200_s22 = smov [#allocation3]  }
   0xb   :  { %14 = dma.vmem_to_smem %s12_s20, 16, %s1200_s22, [#allocation2] }
   0xc   :  { %1158 = dma.done.wait [#allocation2], 16 }
   0xd   :  { %1159 = vsyncadd [#allocation2], 4294967280 }
   0xe   :  { %16 = sfence }
   0xf   :  { %17 = vsyncpa [#allocation5], 0 }
  0x10   :  { %19 = vsyncpa [#allocation5 + $0x1], 0 }
  0x11   :  { %20 = vsyncpa [#allocation7], 0 }
  0x12   :  { %22 = vsyncpa [#allocation7 + $0x1], 0  ;;  %s1239_s23 = smov 0   ;;  %s1241_s0 = smov 0  }
  0x13   :  { %s1243_s24 = smov 0   ;;  %s1245_s25 = smov 0  }
  0x14   :  { %s1247_s26 = smov 0   ;;  %s1249_s27 = smov 0  }
  0x15   :  { %s1251_s28 = smov 0   ;;  %s1253_s29 = smov 0  }
  0x16 LB: > { %s774_s30 = sadd.s32 4294967295, %s1198_s29   ;;  %s775_s6 = sadd.s32 4294967294, %s1198_s29   ;;  %s1198_s29 = sphi %s1253_s29, %s28_s29   ;;  %s1194_s28 = sphi %s1251_s28, %s1522_s28   ;;  %s1190_s27 = sphi %s1249_s27, %s1521_s27   ;;  %s1186_s26 = sphi %s1247_s26, %s1520_s26   ;;  %s1182_s25 = sphi %s1245_s25, %s1519_s25   ;;  %s1178_s24 = sphi %s1243_s24, %s1518_s24   ;;  %s1174_s0 = sphi %s1241_s0, %s1517_s0   ;;  %s1170_s23 = sphi %s1239_s23, %s1516_s23  }
  0x17   : > { %s43_s7 = sadd.s32 1, %s1190_s27  ;;  %s47_s8 = sadd.s32 1, %s1194_s28 }
  0x18   : > { %p45_p5 = scmp.ge.s32.totalorder %s43_s7, 4  ;;  %p154_p6 = scmp.ne.s32.totalorder %s1178_s24, %s1174_s0 }
  0x19   : > { %p155_p7 = scmp.eq.s32.totalorder %s774_s30, 7  ;;  %p160_p10 = scmp.ne.s32.totalorder %s1174_s0, %s1170_s23 }
  0x1a   : > { %s1524_s7 = smov (%p45_p5, %s43_s7), 0  ;;  %s1526_s8 = smov (!%p45_p5, %s47_s8), %s1194_s28 }
  0x1b   : > { %s138_s9 = ssub.s32 %s1190_s27, %s1524_s7  ;;  %p1290_p8 = por %p155_p7, %p154_p6 }
  0x1c   : > { %p49_p9 = scmp.ge.s32.totalorder %s1526_s8, 2  ;;  %p161_p11 = scmp.eq.s32.totalorder %s775_s6, 7 }
  0x1d   : > { %p778_p12 = scmp.ge.s32.totalorder %s1198_s29, 1  ;;  %p247_p0 = scmp.lt.s32.totalorder %s1198_s29, 9 }
  0x1e   : > { %s1528_s8 = smov (%p49_p9, %s1526_s8), 0  ;;  %p1299_p13 = por %p161_p11, %p160_p10 }
  0x1f   : > { %s137_s12 = ssub.s32 %s1194_s28, %s1528_s8  ;;  %s144_s13 = sadd.s32 1, %s1178_s24 }
  0x20   : > { %s139_s14 = sor.u32 %s138_s9, %s137_s12  ;;  %p248_p1 = pnand %p778_p12, %p247_p0 }
  0x21   : > { %p142_p2 = scmp.eq.s32.totalorder %s139_s14, 0  ;;  %p302_p3 = scmp.lt.s32.totalorder (!%p248_p1), %s1186_s26, 1  ;;  %v1201_v0 = vmov (!%p248_p1), 0.0|0.0   ;;  %vm1202_vm0 = vmmov (!%p248_p1), 0   ;;  %v1203_v1 = vmov (!%p248_p1), 0.0   ;;  %vm365_vm1 = vcmask (!%p248_p1), 261120  }
  0x22   : > { %251 = sbr.rel (%p248_p1) target bundleno = 865 (0x361), region = 32  ;;  %p304_p4 = scmp.lt.s32.totalorder (!%p248_p1), %s1182_s25, 3  ;;  %918 = vmatprep.subr.bf16.mxu0 (!%p248_p1), %v1201_v0  ;;  %880 = vmatprep.mubr.msk.f32.mxu0 (!%p248_p1), %vm1202_vm0, %v1203_v1  ;;  %vm1332_vm2 = vmpackc.low (!%p248_p1), %vm365_vm1, %vm365_vm1  ;;  %v488_v29 = vlaneseq (!%p248_p1) }
  0x23   : > { %s1308_s15 = scalar_select %p142_p2, %s1178_s24, %s144_s13  }
  0x24   : > { %950 = vmatprep.subr.bf16.mxu1 (!%p248_p1), %v1201_v0  ;;  %915 = vmatprep.mubr.msk.f32.mxu1 (!%p248_p1), %vm1202_vm0, %v1203_v1  ;;  %v489_v30 = vand.u32 (!%p248_p1), 127, %v488_v29  ;;  %s808_s9 = sshll.u32 (!%p248_p1), %s1186_s26, 2 }
  0x29   : > { %s303_s16 = scalar_select %p302_p3, %s1186_s26, 1 }
  0x2a   : > { %s305_s17 = scalar_select %p304_p4, %s1182_s25, 3 }
  0x2b   : > { %s784_s18 = sshll.u32 %s303_s16, 6  ;;  %s781_s19 = sshll.u32 %s303_s16, 2 }
  0x2c   : > { %s783_s20 = sshll.u32 %s305_s17, 4  ;;  %s1316_s21 = sadd.s32 %s781_s19, %s305_s17 }
  0x2d   : > { %s1318_s22 = sadd.s32 %s784_s18, %s783_s20  ;;  %s782_s13 = sshll.u32 %s1316_s21, 3 }
  0x2e   : > { %s785_s30 = sshll.u32 %s1318_s22, 3  ;;  %s312_s17 = scalar_lea.vmem %s1507_s1, %s782_s13 }
  0x2f   : > { %s1326_s12 = scalar_lea.vmem %s1508_s2, %s785_s30  ;;  %v331_v27 = vld [vmem:[%s312_s17] sm:$0xff]  ;;  %s487_s18 = sld [smem:[#allocation3 + %s1186_s26]] }
  0x30   : > { %v333_v2 = vld [vmem:[%s1326_s12] sm:$0xff]  ;;  %v334_v3 = vld [vmem:[%s1326_s12 + $0x8] sm:$0xff]  ;;  %v335_v6 = vld [vmem:[%s1326_s12 + $0x10] sm:$0xff]  ;;  %v332_v28 = vmul.f32 0.17677669, %v331_v27  ;;  %s1384_s21 = scalar_lea.vmem %s1509_s3, %s785_s30  ;;  %s1410_s22 = sand.u32 1, %s1174_s0  }
  0x31   : > { %v919_v5 = vpack.c.bf16 %v334_v3, %v333_v2  ;;  %v336_v7 = vld [vmem:[%s1326_s12 + $0x18] sm:$0xff]  ;;  %v337_v9 = vld [vmem:[%s1326_s12 + $0x20] sm:$0xff]  ;;  %v338_v10 = vld [vmem:[%s1326_s12 + $0x28] sm:$0xff]  ;;  %s779_s30 = sshll.u32 %s1410_s22, 3  ;;  %s580_s19 = scalar_lea.sflag [#allocation7], %s1410_s22 }
  0x32   : > { %v923_v8 = vpack.c.bf16 %v336_v7, %v335_v6  ;;  %v927_v11 = vpack.c.bf16 %v338_v10, %v337_v9  ;;  %v339_v12 = vld [vmem:[%s1326_s12 + $0x30] sm:$0xff]  ;;  %v340_v13 = vld [vmem:[%s1326_s12 + $0x38] sm:$0xff]  ;;  %v341_v15 = vld [vmem:[%s1326_s12 + $0x40] sm:$0xff]  ;;  %s301_s6 = scalar_lea.vmem [#allocation6], %s779_s30  ;;  %s1204_s26 = smov [#allocation6]  }
  0x33   : > { %921 = vmatpush3.bf16.xpose.msk.msra.mxu0 %vm1332_vm2, %v919_v5  ;;  %v931_v14 = vpack.c.bf16 %v340_v13, %v339_v12  ;;  %v342_v16 = vld [vmem:[%s1326_s12 + $0x48] sm:$0xff]  ;;  %v343_v18 = vld [vmem:[%s1326_s12 + $0x50] sm:$0xff]  ;;  %v344_v19 = vld [vmem:[%s1326_s12 + $0x58] sm:$0xff] }
  0x34   : > { %922 = vmatprep.subr.bf16.mxu0 %v1201_v0  ;;  %v935_v17 = vpack.c.bf16 %v342_v16, %v341_v15  ;;  %v939_v20 = vpack.c.bf16 %v344_v19, %v343_v18  ;;  %v345_v21 = vld [vmem:[%s1326_s12 + $0x60] sm:$0xff]  ;;  %v346_v22 = vld [vmem:[%s1326_s12 + $0x68] sm:$0xff]  ;;  %v347_v24 = vld [vmem:[%s1326_s12 + $0x70] sm:$0xff] }
  0x35   : > { %v943_v23 = vpack.c.bf16 %v346_v22, %v345_v21  ;;  %v348_v25 = vld [vmem:[%s1326_s12 + $0x78] sm:$0xff]  ;;  %v490_v31 = vstv %s487_s18  ;;  %v349_v35 = vld [vmem:[%s1384_s21] sm:$0xff]  ;;  %v350_v36 = vld [vmem:[%s1384_s21 + $0x8] sm:$0xff]  ;;  %s1417_s12 = sadd.s32 %s1182_s25, %s808_s9  ;;  %s612_s18 = sshll.u32 %s301_s6, 4  ;;  %s613_s18 = int_to_ptr.vmem [resolvable:$true] %s612_s18 }
  0x36   : > { %v947_v26 = vpack.c.bf16 %v348_v25, %v347_v24  ;;  %vm491_vm3 = vcmp.lt.s32.totalorder %v489_v30, %v490_v31  ;;  %v351_v37 = vld [vmem:[%s1384_s21 + $0x10] sm:$0xff]  ;;  %v951_v38 = vpack.c.bf16 %v350_v36, %v349_v35  ;;  %v352_v39 = vld [vmem:[%s1384_s21 + $0x18] sm:$0xff]  ;;  %v353_v41 = vld [vmem:[%s1384_s21 + $0x20] sm:$0xff]  ;;  %s809_s13 = sshll.u32 %s1417_s12, 7  ;;  %s1070_s20 = scalar_lea.vmem %s613_s18, 128 }
  0x37   : > { %v954_v40 = vpack.c.bf16 %v352_v39, %v351_v37  ;;  %v354_v42 = vld [vmem:[%s1384_s21 + $0x28] sm:$0xff]  ;;  %v355_v44 = vld [vmem:[%s1384_s21 + $0x30] sm:$0xff]  ;;  %v356_v45 = vld [vmem:[%s1384_s21 + $0x38] sm:$0xff]  ;;  %s1425_s17 = scalar_lea.hbm %s1511_s5, %s809_s13  ;;  %p1071_p5 = scmp.ne.s32.totalorder %s613_s18, %s1070_s20 }
  0x38   : > { %952 = vmatpush3.bf16.msra.mxu1 %v951_v38  ;;  %v957_v43 = vpack.c.bf16 %v354_v42, %v353_v41  ;;  %v960_v46 = vpack.c.bf16 %v356_v45, %v355_v44  ;;  %v357_v47 = vld [vmem:[%s1384_s21 + $0x40] sm:$0xff]  ;;  %v358_v48 = vld [vmem:[%s1384_s21 + $0x48] sm:$0xff]  ;;  %v359_v54 = vld [vmem:[%s1384_s21 + $0x50] sm:$0xff]  ;;  %s1074_s25 = sshll.u32 %s1204_s26, 4  ;;  %s1075_s25 = int_to_ptr.vmem [resolvable:$false] %s1074_s25 }
  0x39   : > { %953 = vmatprep.subr.bf16.mxu1 %v1201_v0  ;;  %v963_v49 = vpack.c.bf16 %v358_v48, %v357_v47  ;;  %v360_v55 = vld [vmem:[%s1384_s21 + $0x58] sm:$0xff]  ;;  %v361_v57 = vld [vmem:[%s1384_s21 + $0x60] sm:$0xff]  ;;  %v362_v58 = vld [vmem:[%s1384_s21 + $0x68] sm:$0xff]  ;;  %p1072_p6 = pnand %p1071_p5, %p1290_p8  ;;  %p1077_p9 = scmp.lt.s32.totalorder %s613_s18, %s1075_s25 }
  0x3a   : > { %v966_v56 = vpack.c.bf16 %v360_v55, %v359_v54  ;;  %v969_v59 = vpack.c.bf16 %v362_v58, %v361_v57  ;;  %v363_v60 = vld [vmem:[%s1384_s21 + $0x70] sm:$0xff]  ;;  %v364_v61 = vld [vmem:[%s1384_s21 + $0x78] sm:$0xff]  ;;  %s1076_s21 = scalar_lea.vmem %s1075_s25, 256 }
  0x3b   : > { %925 = vmatpush3.bf16.xpose.msk.msra.mxu0 %vm1332_vm2, %v923_v8  ;;  %v972_v62 = vpack.c.bf16 %v364_v61, %v363_v60  ;;  %p1073_p7 = pneg %p1072_p6  ;;  %p1078_p10 = scmp.lt.s32.totalorder %s1076_s21, %s1070_s20 }
  0x3c   : > { %926 = vmatprep.subr.bf16.mxu0 %v1201_v0  ;;  %955 = vmatpush3.bf16.msra.mxu1 %v954_v40 }
  0x3d   : > { %956 = vmatprep.subr.bf16.mxu1 %v1201_v0  ;;  %p1079_p11 = por %p1078_p10, %p1077_p9 }
  0x3f   : > { %p1080_p12 = pnand %p1079_p11, %p1073_p7 }
  0x40   : > { %958 = vmatpush3.bf16.msra.mxu1 %v957_v43 }
  0x41   : > { %959 = vmatprep.subr.bf16.mxu1 %v1201_v0 }
  0x43   : > { %929 = vmatpush3.bf16.xpose.msk.msra.mxu0 %vm1332_vm2, %v927_v11 }
  0x44   : > { %930 = vmatprep.subr.bf16.mxu0 %v1201_v0  ;;  %961 = vmatpush3.bf16.msra.mxu1 %v960_v46 }
  0x45   : > { %962 = vmatprep.subr.bf16.mxu1 %v1201_v0 }
  0x48   : > { %964 = vmatpush3.bf16.msra.mxu1 %v963_v49 }
  0x49   : > { %965 = vmatprep.subr.bf16.mxu1 %v1201_v0 }
  0x4b   : > { %933 = vmatpush3.bf16.xpose.msk.msra.mxu0 %vm1332_vm2, %v931_v14 }
  0x4c   : > { %934 = vmatprep.subr.bf16.mxu0 %v1201_v0  ;;  %967 = vmatpush3.bf16.msra.mxu1 %v966_v56 }
  0x4d   : > { %968 = vmatprep.subr.bf16.mxu1 %v1201_v0 }
  0x50   : > { %970 = vmatpush3.bf16.msra.mxu1 %v969_v59 }
  0x51   : > { %971 = vmatprep.subr.bf16.mxu1 %v1201_v0 }
  0x53   : > { %937 = vmatpush3.bf16.xpose.msk.msra.mxu0 %vm1332_vm2, %v935_v17 }
  0x54   : > { %938 = vmatprep.subr.bf16.mxu0 %v1201_v0  ;;  %973 = vmatpush3.bf16.msra.mxu1 %v972_v62 }
  0x5b   : > { %941 = vmatpush3.bf16.xpose.msk.msra.mxu0 %vm1332_vm2, %v939_v20 }
  0x5c   : > { %942 = vmatprep.subr.bf16.mxu0 %v1201_v0 }
  0x63   : > { %945 = vmatpush3.bf16.xpose.msk.msra.mxu0 %vm1332_vm2, %v943_v23 }
  0x64   : > { %946 = vmatprep.subr.bf16.mxu0 %v1201_v0 }
  0x6b   : > { %949 = vmatpush3.bf16.xpose.msk.msra.mxu0 %vm1332_vm2, %v947_v26 }
  0x72   : > { %881 = vmatmul.mubr.msk.f32.vlgmr.msra.gmra.mrb[0].mxu0 %vm365_vm1, %v332_v28 }
 0x145   : > { %v483_v32 = vpop.f32.mrb[0].mxu0 }
 0x146   : > { %v882_v33 = vpop.f32.mrb[1].mxu0  ;;  %v492_v34 = vsel %vm491_vm3, %v483_v32, -1e+09 }
 0x147   : > { %493 = vmax.xlane.f32.xlu0 %v492_v34 }
 0x1d4   : > { %v494_v50 = vpop.xlane.xlu0 %493 }
 0x1d5   : > { %v495_v51 = vsub.f32 %v492_v34, %v494_v50 }
 0x1d7   : > { %v496_v52 = vmul.f32 1.442695, %v495_v51 }
 0x1d9   : > { %1054 = vpow2.f32 %v496_v52 }
 0x1e3   : > { %v1055_v53 = vpop.eup %1054 }
 0x1e4   : > { %498 = vadd.xlane.f32.xlu0 %v1055_v53 }
 0x271   : > { %v499_v63 = vpop.xlane.xlu0 %498 }
 0x272   : > { %1056 = vrcp.f32 %v499_v63 }
 0x27c   : > { %v1057_v1 = vpop.eup %1056 }
 0x27d   : > { %v501_v2 = vmul.f32 %v1057_v1, %v1055_v53 }
 0x27f   : > { %916 = vmatmul.mubr.f32.vlgmr.msra.gmra.mrb[0].mxu1 %v501_v2  ;;  %502 = vst [vmem:[%s301_s6] sm:$0xff] %v501_v2 }
 0x280   : > { %1083 = shalt.err (!%p1080_p12)
}
 0x281   : > { %s1084_s6 = scalar_lea.hbm %s1425_s17, 128  ;;  %s1088_s16 = scalar_lea.hbm %s1511_s5, 1024 }
 0x282   : > { %p1085_p0 = scmp.ne.s32.totalorder %s1425_s17, %s1084_s6  ;;  %p1089_p3 = scmp.lt.u32.totalorder %s1425_s17, %s1511_s5 }
 0x283   : > { %p1090_p4 = scmp.lt.u32.totalorder %s1088_s16, %s1084_s6  ;;  %p1092_p6 = scmp.lt.u32.totalorder %s1084_s6, %s1425_s17 }
 0x284   : > { %p1086_p1 = pnand %p1085_p0, %p1290_p8 }
 0x285   : > { %p1091_p5 = por %p1090_p4, %p1089_p3 }
 0x286   : > { %p1087_p2 = pneg %p1086_p1 }
 0x287   : > { %p1093_p7 = por %p1092_p6, %p1091_p5 }
 0x289   : > { %p1094_p9 = pnand %p1093_p7, %p1087_p2 }
 0x28b   : > { %1097 = shalt.err (!%p1094_p9)
}
 0x28c   : > { %975 = dma.vmem_to_hbm [thread:$0]  (%p1290_p8), %s613_s18, 128, %s1425_s17, %s580_s19  }
 0x28d   : > { %s294_s20 = scalar_lea.vmem [#allocation4], %s779_s30  ;;  %s1454_s6 = scalar_lea.hbm %s1510_s4, %s809_s13 }
 0x28e   : > { %s596_s21 = sshll.u32 %s294_s20, 4  ;;  %s575_s16 = scalar_lea.sflag [#allocation5], %s1410_s22  ;;  %s1447_s21 = int_to_ptr.vmem [resolvable:$true] %s596_s21 }
 0x28f   : > { %s1098_s26 = scalar_lea.vmem %s1447_s21, 128  ;;  %s1205_s30 = smov [#allocation4]  }
 0x290   : > { %p1099_p10 = scmp.ne.s32.totalorder %s1447_s21, %s1098_s26  ;;  %s1102_s17 = sshll.u32 %s1205_s30, 4  ;;  %s1103_s17 = int_to_ptr.vmem [resolvable:$false] %s1102_s17 }
 0x291   : > { %s1104_s12 = scalar_lea.vmem %s1103_s17, 256  ;;  %p1105_p0 = scmp.lt.s32.totalorder %s1447_s21, %s1103_s17 }
 0x292   : > { %p1100_p11 = pnand %p1099_p10, %p1290_p8  ;;  %p1106_p1 = scmp.lt.s32.totalorder %s1104_s12, %s1098_s26 }
 0x294   : > { %p1101_p12 = pneg %p1100_p11  ;;  %p1107_p2 = por %p1106_p1, %p1105_p0 }
 0x296   : > { %p1108_p3 = pnand %p1107_p2, %p1101_p12 }
 0x352   : > { %v569_v0 = vpop.f32.mrb[0].mxu1 }
 0x353   : > { %573 = vst [vmem:[%s294_s20] sm:$0xff] %v569_v0  ;;  %v917_v3 = vpop.f32.mrb[1].mxu1 }
 0x354   : > { %1111 = shalt.err (!%p1108_p3)
}
 0x355   : > { %s1112_s22 = scalar_lea.hbm %s1454_s6, 128  ;;  %s1116_s19 = scalar_lea.hbm %s1510_s4, 1024 }
 0x356   : > { %p1113_p4 = scmp.ne.s32.totalorder %s1454_s6, %s1112_s22  ;;  %p1117_p7 = scmp.lt.u32.totalorder %s1454_s6, %s1510_s4 }
 0x357   : > { %p1118_p9 = scmp.lt.u32.totalorder %s1116_s19, %s1112_s22  ;;  %p1120_p11 = scmp.lt.u32.totalorder %s1112_s22, %s1454_s6 }
 0x358   : > { %p1114_p5 = pnand %p1113_p4, %p1290_p8 }
 0x359   : > { %p1119_p10 = por %p1118_p9, %p1117_p7 }
 0x35a   : > { %p1115_p6 = pneg %p1114_p5 }
 0x35b   : > { %p1121_p12 = por %p1120_p11, %p1119_p10 }
 0x35d   : > { %p1122_p0 = pnand %p1121_p12, %p1115_p6 }
 0x35f   : > { %1125 = shalt.err (!%p1122_p0)
}
 0x360   : > { %974 = dma.vmem_to_hbm [thread:$0]  (%p1290_p8), %s1447_s21, 128, %s1454_s6, %s575_s16  }
 0x361 PF: > { %p985_p1 = scmp.ge.s32.totalorder %s1198_s29, 2  ;;  %s624_s9 = sand.u32 1, %s1170_s23  }
 0x362   : > { %s625_s14 = scalar_lea.sflag [#allocation5], %s624_s9 }
 0x363   : > { %p979_p2 = pnand %p985_p1, %p1299_p13 }
 0x365   : > { %1161 = dma.done.wait (!%p979_p2), %s625_s14, 128  }
 0x366   : > { %1163 = vsyncadd (!%p979_p2), %s625_s14, 4294967168  ;;  %s634_s26 = scalar_lea.sflag [#allocation7], %s624_s9 }
 0x367   : > { %1165 = dma.done.wait (!%p979_p2), %s634_s26, 128  }
 0x368   : > { %1167 = vsyncadd (!%p979_p2), %s634_s26, 4294967168  ;;  %s28_s29 = sadd.s32 1, %s1198_s29   ;;  %s1516_s23 = smov %s1174_s0 }
 0x369   : > { %p25_p3 = scmp.ge.s32.totalorder %s28_s29, 10   ;;  %s1517_s0 = smov %s1178_s24 }
 0x36a   : > { %s1518_s24 = smov %s1308_s15  ;;  %s1519_s25 = smov %s1190_s27 }
 0x36b   : > { %s1520_s26 = smov %s1194_s28  ;;  %s1521_s27 = smov %s1524_s7 }
 0x36c   : > { %s1522_s28 = smov %s1528_s8  ;;  %27 = sbr.rel (!%p25_p3) target bundleno = 22 (0x16), region = 90 }
 0x373   :  { %639 = vsyncpa [#allocation5], 1 }
 0x374   :  { %641 = vsyncpa [#allocation5 + $0x1], 1 }
 0x375   :  { %642 = vsyncpa [#allocation7], 1 }
 0x376   :  { %644 = vsyncpa [#allocation7 + $0x1], 1 }

</bundles_post_ra>
